<compile_context>
chip_gen: v7x
topology: tpu7x:2x2x1
jax: 0.10.0
libtpu: 0.0.40
codegen_flags: <defaults>
</compile_context>

<pallas_src>
import functools
import math

import jax
import jax.numpy as jnp
from jax.experimental import pallas as pl
from jax.experimental.pallas import tpu as pltpu

_LANE = 128
_SUBLANE_BF16 = 16      # bf16 packs 16 rows per vreg
_MXU_M = 256            # v6e/v7x MXU tile width (harmless alignment on v5e)


def _round_up(x, m):
    return ((x + m - 1) // m) * m


def _choose_batch_tile(B, batch_tile):
    """Pick (tb, B_padded): bf16-sublane aligned, 128/256-aligned for the MXU,
    low padding waste, and >=2 grid steps (v7x megacore) when B allows it."""
    B16 = _round_up(B, _SUBLANE_BF16)
    if B16 <= _MXU_M:
        return B16, B16                       # tiny batch: single small step
    cap = _round_up(min(batch_tile, B16), _LANE)
    candidates = list(range(_LANE, cap + 1, _LANE))

    def score(tb):
        B_p = _round_up(B16, tb)
        steps = B_p // tb
        waste = B_p - B16
        return (steps < 2,                    # want >=2 steps for 2 TCs (v7x)
                waste > tb // 2,              # avoid heavy padding waste
                tb % _MXU_M != 0,             # prefer 256-aligned M
                -tb)                          # then biggest tile (overhead)

    tb = min(candidates, key=score)
    return tb, _round_up(B16, tb)


# ---------------------------------------------------------------------------
# Kernel
# ---------------------------------------------------------------------------
def _actor_kernel(state_ref, eps_ref, w1_ref, b1_ref, w2_ref, b2_ref,
                  w3_ref, b3_ref, w4_ref, b4_ref, aux_ref, out_ref,
                  *, action_dim, state_pad, act_pad, out_pad,
                  min_action, max_action):
    tb = state_ref.shape[0]

    # --- narrow HBM streams -> lane-padded VMEM operands -------------------
    x = state_ref[...]                                            # f32 [tb, S]
    if state_pad:
        x = jnp.concatenate([x, jnp.zeros((tb, state_pad), x.dtype)], axis=-1)
    x = x.astype(jnp.bfloat16)                                    # [tb, S_p]

    eps = eps_ref[...]                                            # f32 [tb, A]
    if act_pad:
        eps = jnp.concatenate([eps, jnp.zeros((tb, act_pad), eps.dtype)],
                              axis=-1)                            # [tb, A_p]

    # --- MLP: bf16 operands, f32 accumulation on the MXU -------------------
    h = jnp.dot(x, w1_ref[...], preferred_element_type=jnp.float32) + b1_ref[...]
    h = jnp.maximum(h, 0.0).astype(jnp.bfloat16)
    h = jnp.dot(h, w2_ref[...], preferred_element_type=jnp.float32) + b2_ref[...]
    h = jnp.maximum(h, 0.0).astype(jnp.bfloat16)
    h = jnp.dot(h, w3_ref[...], preferred_element_type=jnp.float32) + b3_ref[...]
    h = jnp.maximum(h, 0.0).astype(jnp.bfloat16)
    mean = jnp.dot(h, w4_ref[...], preferred_element_type=jnp.float32) + b4_ref[...]

    # --- Normal(mean, std); log_std/std/inv_std precomputed in the wrapper --
    aux = aux_ref[...]                                            # [8, A_p]
    log_std = aux[0:1, :]
    std = aux[1:2, :]
    inv_std = aux[2:3, :]

    # rsample + clamp (as in the PyTorch module), f32 tail
    action = jnp.clip(mean + std * eps, min_action, max_action)

    # Normal.log_prob(action) = -0.5*((a-mu)/std)^2 - log_std - 0.5*log(2*pi)
    z = (action - mean) * inv_std
    lp = -0.5 * z * z - log_std - 0.5 * math.log(2.0 * math.pi)

    # mask the zero-padded action lanes out of the reduction
    lane = jax.lax.broadcasted_iota(jnp.int32, lp.shape, 1)
    lp = jnp.where(lane < action_dim, lp, 0.0)
    lp_sum = jnp.sum(lp, axis=-1, keepdims=True)                  # [tb, 1]

    # --- fused output: lanes [0, A) = action, lane A = log_prob -------------
    if out_pad:
        action = jnp.concatenate(
            [action, jnp.zeros((tb, out_pad), action.dtype)], axis=-1)
    out_lane = jax.lax.broadcasted_iota(jnp.int32, out_ref.shape, 1)
    out_ref[...] = jnp.where(out_lane == action_dim, lp_sum, action)


# ---------------------------------------------------------------------------
# One-time parameter preparation (off the hot path)
# ---------------------------------------------------------------------------
def prepare_params(params, min_log_std=-20.0, max_log_std=2.0):
    """Pad/cast weights once and precompute clamp(log_std), std, 1/std."""
    w1, b1, w2, b2, w3, b3, w4, b4, log_std = params
    S, H = w1.shape
    A = w4.shape[1]
    S_p, H_p, A_p = (_round_up(d, _LANE) for d in (S, H, A))

    def pad2(x, r, c, dtype):
        x = x.reshape(1, -1) if x.ndim == 1 else x
        return jnp.pad(x, ((0, r - x.shape[0]), (0, c - x.shape[1]))).astype(dtype)

    ls = jnp.clip(log_std.reshape(1, -1), min_log_std, max_log_std)
    aux = jnp.concatenate([ls, jnp.exp(ls), jnp.exp(-ls)], axis=0)   # [3, A]
    aux = pad2(aux, 8, A_p, jnp.float32)                             # sublane pad

    return dict(
        S=S, H=H, A=A, S_p=S_p, H_p=H_p, A_p=A_p,
        w1=pad2(w1, S_p, H_p, jnp.bfloat16), b1=pad2(b1, 1, H_p, jnp.float32),
        w2=pad2(w2, H_p, H_p, jnp.bfloat16), b2=pad2(b2, 1, H_p, jnp.float32),
        w3=pad2(w3, H_p, H_p, jnp.bfloat16), b3=pad2(b3, 1, H_p, jnp.float32),
        w4=pad2(w4, H_p, A_p, jnp.bfloat16), b4=pad2(b4, 1, A_p, jnp.float32),
        aux=aux)


# ---------------------------------------------------------------------------
# Wrapper
# ---------------------------------------------------------------------------
def actor_forward(state, prepared, eps,
                  min_action=-1.0, max_action=1.0, batch_tile=512):
    """state: [B, state_dim] f32; eps: [B, action_dim] f32 (rsample noise).
    Returns (action [B, action_dim] f32, log_prob [B, 1] f32)."""
    B, S = state.shape
    A = prepared["A"]
    assert S == prepared["S"] and eps.shape == (B, A)
    S_p, H_p, A_p = prepared["S_p"], prepared["H_p"], prepared["A_p"]
    OUT_p = _round_up(A + 1, _LANE)        # action lanes + 1 lane for log_prob

    tb, B_p = _choose_batch_tile(B, batch_tile)

    # Activation streams stay lane-narrow in HBM; only the batch dim is padded.
    state_p = jnp.pad(state.astype(jnp.float32), ((0, B_p - B), (0, 0)))
    eps_p = jnp.pad(eps.astype(jnp.float32), ((0, B_p - B), (0, 0)))

    kernel = functools.partial(
        _actor_kernel,
        action_dim=A,
        state_pad=S_p - S, act_pad=A_p - A, out_pad=OUT_p - A_p,
        min_action=min_action, max_action=max_action)

    w_args = (prepared["w1"], prepared["b1"], prepared["w2"], prepared["b2"],
              prepared["w3"], prepared["b3"], prepared["w4"], prepared["b4"],
              prepared["aux"])

    def row_spec(shape):       # batch-tiled per grid step
        return pl.BlockSpec(shape, lambda i: (i, 0))

    def const_spec(shape):     # resident + single-buffered weights/biases
        return pl.BlockSpec(shape, lambda i: (0, 0),
                            pipeline_mode=pl.Buffered(1))

    in_specs = [
        row_spec((tb, S)),                                 # state (narrow)
        row_spec((tb, A)),                                 # eps   (narrow)
        const_spec((S_p, H_p)), const_spec((1, H_p)),      # w1, b1
        const_spec((H_p, H_p)), const_spec((1, H_p)),      # w2, b2
        const_spec((H_p, H_p)), const_spec((1, H_p)),      # w3, b3
        const_spec((H_p, A_p)), const_spec((1, A_p)),      # w4, b4
        const_spec((8, A_p)),                              # [log_std; std; 1/std]
    ]

    grid_steps = B_p // tb
    const_bytes = sum(int(x.size) * x.dtype.itemsize for x in w_args)
    stream_bytes = (int(state_p.size) + int(eps_p.size) + B_p * OUT_p) * 4
    flops = 2 * B_p * (S_p * H_p + 2 * H_p * H_p + H_p * A_p)

    # single-buffered resident weights + double-buffered activation streams
    # + working set for the hidden activations, capped to v7x's 64 MiB VMEM.
    vmem_limit = (const_bytes
                  + 2 * 2 * tb * (S + A + OUT_p) * 4
                  + 4 * tb * H_p * 4
                  + (4 << 20))
    vmem_limit = int(min(64 << 20, max(16 << 20, vmem_limit)))

    out_p = pl.pallas_call(
        kernel,
        out_shape=jax.ShapeDtypeStruct((B_p, OUT_p), jnp.float32),
        grid=(grid_steps,),
        in_specs=in_specs,
        out_specs=row_spec((tb, OUT_p)),
        compiler_params=pltpu.CompilerParams(
            dimension_semantics=("parallel",),      # shard batch over 2 TCs (v7x)
            vmem_limit_bytes=vmem_limit),
        cost_estimate=pl.CostEstimate(
            flops=flops, transcendentals=0,
            bytes_accessed=const_bytes + stream_bytes),
    )(state_p, eps_p, *w_args)

    action = out_p[:B, :A]
    log_prob = out_p[:B, A:A + 1]
    return action, log_prob


# ---------------------------------------------------------------------------
# Synthetic params + pure-JAX reference (same bf16-operand / f32-acc math)
# ---------------------------------------------------------------------------
def init_params(key, state_dim, action_dim, hidden_dim):
    """Weights stored [in, out], biases [1, out] (matches nn.Linear init range)."""
    ks = jax.random.split(key, 8)

    def lin(kw, kb, fan_in, fan_out):
        bound = 1.0 / math.sqrt(fan_in)
        w = jax.random.uniform(kw, (fan_in, fan_out), jnp.float32, -bound, bound)
        b = jax.random.uniform(kb, (1, fan_out), jnp.float32, -bound, bound)
        return w, b

    w1, b1 = lin(ks[0], ks[1], state_dim, hidden_dim)
    w2, b2 = lin(ks[2], ks[3], hidden_dim, hidden_dim)
    w3, b3 = lin(ks[4], ks[5], hidden_dim, hidden_dim)
    w4, b4 = lin(ks[6], ks[7], hidden_dim, action_dim)
    log_std = jnp.zeros((1, action_dim), jnp.float32)
    return (w1, b1, w2, b2, w3, b3, w4, b4, log_std)


def actor_forward_ref(state, params, eps,
                      min_log_std=-20.0, max_log_std=2.0,
                      min_action=-1.0, max_action=1.0):
    w1, b1, w2, b2, w3, b3, w4, b4, log_std = params

    def dot(a, b):
        return jnp.dot(a.astype(jnp.bfloat16), b.astype(jnp.bfloat16),
                       preferred_element_type=jnp.float32)

    h = jax.nn.relu(dot(state, w1) + b1)
    h = jax.nn.relu(dot(h, w2) + b2)
    h = jax.nn.relu(dot(h, w3) + b3)
    mean = dot(h, w4) + b4
    ls = jnp.clip(log_std, min_log_std, max_log_std)
    std = jnp.exp(ls)
    inv_std = jnp.exp(-ls)
    action = jnp.clip(mean + std * eps, min_action, max_action)
    z = (action - mean) * inv_std
    lp = -0.5 * z * z - ls - 0.5 * math.log(2.0 * math.pi)
    return action, jnp.sum(lp, axis=-1, keepdims=True)


if __name__ == "__main__":
    state_dim, action_dim, hidden_dim, batch = 16, 8, 32, 8

    key = jax.random.PRNGKey(0)
    k_param, k_state, k_eps = jax.random.split(key, 3)

    params = init_params(k_param, state_dim, action_dim, hidden_dim)
    state = jax.random.normal(k_state, (batch, state_dim), jnp.float32)
    # TODO(synk): torch's policy.rsample() draws noise internally; we pass the
    # standard-normal eps explicitly to keep the kernel deterministic/testable.
    eps = jax.random.normal(k_eps, (batch, action_dim), jnp.float32)

    prepared = prepare_params(params)          # one-time pad/cast of weights
    action, log_prob = actor_forward(state, prepared, eps)
    jax.block_until_ready((action, log_prob))

    # sanity check vs pure-JAX reference (same bf16 matmul math)
    a_ref, lp_ref = actor_forward_ref(state, params, eps)
    assert action.shape == (batch, action_dim)
    assert log_prob.shape == (batch, 1)
    assert jnp.allclose(action, a_ref, atol=2e-3, rtol=2e-3)
    assert jnp.allclose(log_prob, lp_ref, atol=1e-2, rtol=1e-2)

    print("KERNEL_OK")
</pallas_src>

<mosaic_0001>
module attributes {stable_mosaic.version = 11 : i64} {
  func.func @_actor_kernel(%arg0: i32, %arg1: memref<16x16xf32, #tpu.memory_space<vmem>>, %arg2: memref<16x8xf32, #tpu.memory_space<vmem>>, %arg3: memref<128x128xbf16, #tpu.memory_space<vmem>>, %arg4: memref<1x128xf32, #tpu.memory_space<vmem>>, %arg5: memref<128x128xbf16, #tpu.memory_space<vmem>>, %arg6: memref<1x128xf32, #tpu.memory_space<vmem>>, %arg7: memref<128x128xbf16, #tpu.memory_space<vmem>>, %arg8: memref<1x128xf32, #tpu.memory_space<vmem>>, %arg9: memref<128x128xbf16, #tpu.memory_space<vmem>>, %arg10: memref<1x128xf32, #tpu.memory_space<vmem>>, %arg11: memref<8x128xf32, #tpu.memory_space<vmem>>, %arg12: memref<16x128xf32, #tpu.memory_space<vmem>>) attributes {dimension_semantics = [#tpu.dimension_semantics<parallel>], iteration_bounds = array<i64: 1>, scalar_prefetch = 0 : i64, scratch_operands = 0 : i64, tpu.core_type = #tpu.core_type<tc>, window_params = [{transform_indices = @transform_0, window_bounds = array<i64: 16, 16>}, {transform_indices = @transform_1, window_bounds = array<i64: 16, 8>}, {pipeline_mode = #tpu.pipeline_mode<synchronous>, transform_indices = @transform_2, window_bounds = array<i64: 128, 128>}, {pipeline_mode = #tpu.pipeline_mode<synchronous>, transform_indices = @transform_3, window_bounds = array<i64: 1, 128>}, {pipeline_mode = #tpu.pipeline_mode<synchronous>, transform_indices = @transform_4, window_bounds = array<i64: 128, 128>}, {pipeline_mode = #tpu.pipeline_mode<synchronous>, transform_indices = @transform_5, window_bounds = array<i64: 1, 128>}, {pipeline_mode = #tpu.pipeline_mode<synchronous>, transform_indices = @transform_6, window_bounds = array<i64: 128, 128>}, {pipeline_mode = #tpu.pipeline_mode<synchronous>, transform_indices = @transform_7, window_bounds = array<i64: 1, 128>}, {pipeline_mode = #tpu.pipeline_mode<synchronous>, transform_indices = @transform_8, window_bounds = array<i64: 128, 128>}, {pipeline_mode = #tpu.pipeline_mode<synchronous>, transform_indices = @transform_9, window_bounds = array<i64: 1, 128>}, {pipeline_mode = #tpu.pipeline_mode<synchronous>, transform_indices = @transform_10, window_bounds = array<i64: 8, 128>}, {transform_indices = @transform_11, window_bounds = array<i64: 16, 128>}]} {
    %c0 = arith.constant 0 : index
    %c0_0 = arith.constant 0 : index
    %0 = vector.load %arg1[%c0, %c0_0] : memref<16x16xf32, #tpu.memory_space<vmem>>, vector<16x16xf32>
    %cst = arith.constant 0.000000e+00 : f32
    %1 = vector.broadcast %cst : f32 to vector<16x112xf32>
    %2 = tpu.concatenate %0, %1 in 1 : vector<16x16xf32>, vector<16x112xf32> -> vector<16x128xf32>
    %3 = arith.truncf %2 : vector<16x128xf32> to vector<16x128xbf16>
    %c0_1 = arith.constant 0 : index
    %c0_2 = arith.constant 0 : index
    %4 = vector.load %arg2[%c0_1, %c0_2] : memref<16x8xf32, #tpu.memory_space<vmem>>, vector<16x8xf32>
    %cst_3 = arith.constant 0.000000e+00 : f32
    %5 = vector.broadcast %cst_3 : f32 to vector<16x120xf32>
    %6 = tpu.concatenate %4, %5 in 1 : vector<16x8xf32>, vector<16x120xf32> -> vector<16x128xf32>
    %c0_4 = arith.constant 0 : index
    %c0_5 = arith.constant 0 : index
    %7 = vector.load %arg3[%c0_4, %c0_5] : memref<128x128xbf16, #tpu.memory_space<vmem>>, vector<128x128xbf16>
    %cst_6 = arith.constant dense<0.000000e+00> : vector<16x128xf32>
    %8 = tpu.matmul %3, %7, %cst_6 {dimension_numbers = #tpu.dot_dimension_numbers<[1], [0], [0], [1], [0, 0, 1, 1], [], []>} : vector<16x128xbf16>, vector<128x128xbf16>, vector<16x128xf32> -> vector<16x128xf32>
    %c0_7 = arith.constant 0 : index
    %c0_8 = arith.constant 0 : index
    %9 = vector.load %arg4[%c0_7, %c0_8] : memref<1x128xf32, #tpu.memory_space<vmem>>, vector<1x128xf32>
    %10 = vector.broadcast %9 : vector<1x128xf32> to vector<16x128xf32>
    %11 = arith.addf %8, %10 : vector<16x128xf32>
    %cst_9 = arith.constant 0.000000e+00 : f32
    %12 = vector.broadcast %cst_9 : f32 to vector<16x128xf32>
    %13 = arith.maximumf %11, %12 : vector<16x128xf32>
    %14 = arith.truncf %13 : vector<16x128xf32> to vector<16x128xbf16>
    %c0_10 = arith.constant 0 : index
    %c0_11 = arith.constant 0 : index
    %15 = vector.load %arg5[%c0_10, %c0_11] : memref<128x128xbf16, #tpu.memory_space<vmem>>, vector<128x128xbf16>
    %cst_12 = arith.constant dense<0.000000e+00> : vector<16x128xf32>
    %16 = tpu.matmul %14, %15, %cst_12 {dimension_numbers = #tpu.dot_dimension_numbers<[1], [0], [0], [1], [0, 0, 1, 1], [], []>} : vector<16x128xbf16>, vector<128x128xbf16>, vector<16x128xf32> -> vector<16x128xf32>
    %c0_13 = arith.constant 0 : index
    %c0_14 = arith.constant 0 : index
    %17 = vector.load %arg6[%c0_13, %c0_14] : memref<1x128xf32, #tpu.memory_space<vmem>>, vector<1x128xf32>
    %18 = vector.broadcast %17 : vector<1x128xf32> to vector<16x128xf32>
    %19 = arith.addf %16, %18 : vector<16x128xf32>
    %cst_15 = arith.constant 0.000000e+00 : f32
    %20 = vector.broadcast %cst_15 : f32 to vector<16x128xf32>
    %21 = arith.maximumf %19, %20 : vector<16x128xf32>
    %22 = arith.truncf %21 : vector<16x128xf32> to vector<16x128xbf16>
    %c0_16 = arith.constant 0 : index
    %c0_17 = arith.constant 0 : index
    %23 = vector.load %arg7[%c0_16, %c0_17] : memref<128x128xbf16, #tpu.memory_space<vmem>>, vector<128x128xbf16>
    %cst_18 = arith.constant dense<0.000000e+00> : vector<16x128xf32>
    %24 = tpu.matmul %22, %23, %cst_18 {dimension_numbers = #tpu.dot_dimension_numbers<[1], [0], [0], [1], [0, 0, 1, 1], [], []>} : vector<16x128xbf16>, vector<128x128xbf16>, vector<16x128xf32> -> vector<16x128xf32>
    %c0_19 = arith.constant 0 : index
    %c0_20 = arith.constant 0 : index
    %25 = vector.load %arg8[%c0_19, %c0_20] : memref<1x128xf32, #tpu.memory_space<vmem>>, vector<1x128xf32>
    %26 = vector.broadcast %25 : vector<1x128xf32> to vector<16x128xf32>
    %27 = arith.addf %24, %26 : vector<16x128xf32>
    %cst_21 = arith.constant 0.000000e+00 : f32
    %28 = vector.broadcast %cst_21 : f32 to vector<16x128xf32>
    %29 = arith.maximumf %27, %28 : vector<16x128xf32>
    %30 = arith.truncf %29 : vector<16x128xf32> to vector<16x128xbf16>
    %c0_22 = arith.constant 0 : index
    %c0_23 = arith.constant 0 : index
    %31 = vector.load %arg9[%c0_22, %c0_23] : memref<128x128xbf16, #tpu.memory_space<vmem>>, vector<128x128xbf16>
    %cst_24 = arith.constant dense<0.000000e+00> : vector<16x128xf32>
    %32 = tpu.matmul %30, %31, %cst_24 {dimension_numbers = #tpu.dot_dimension_numbers<[1], [0], [0], [1], [0, 0, 1, 1], [], []>} : vector<16x128xbf16>, vector<128x128xbf16>, vector<16x128xf32> -> vector<16x128xf32>
    %c0_25 = arith.constant 0 : index
    %c0_26 = arith.constant 0 : index
    %33 = vector.load %arg10[%c0_25, %c0_26] : memref<1x128xf32, #tpu.memory_space<vmem>>, vector<1x128xf32>
    %34 = vector.broadcast %33 : vector<1x128xf32> to vector<16x128xf32>
    %35 = arith.addf %32, %34 : vector<16x128xf32>
    %c0_27 = arith.constant 0 : index
    %c0_28 = arith.constant 0 : index
    %36 = vector.load %arg11[%c0_27, %c0_28] : memref<8x128xf32, #tpu.memory_space<vmem>>, vector<8x128xf32>
    %37 = vector.extract_strided_slice %36 {offsets = [0, 0], sizes = [1, 128], strides = [1, 1]} : vector<8x128xf32> to vector<1x128xf32>
    %38 = vector.extract_strided_slice %36 {offsets = [1, 0], sizes = [1, 128], strides = [1, 1]} : vector<8x128xf32> to vector<1x128xf32>
    %39 = vector.extract_strided_slice %36 {offsets = [2, 0], sizes = [1, 128], strides = [1, 1]} : vector<8x128xf32> to vector<1x128xf32>
    %40 = vector.broadcast %38 : vector<1x128xf32> to vector<16x128xf32>
    %41 = arith.mulf %40, %6 : vector<16x128xf32>
    %42 = arith.addf %35, %41 : vector<16x128xf32>
    %cst_29 = arith.constant -1.000000e+00 : f32
    %cst_30 = arith.constant 1.000000e+00 : f32
    %43 = vector.broadcast %cst_29 : f32 to vector<16x128xf32>
    %44 = arith.maximumf %43, %42 : vector<16x128xf32>
    %45 = vector.broadcast %cst_30 : f32 to vector<16x128xf32>
    %46 = arith.minimumf %45, %44 : vector<16x128xf32>
    %47 = arith.subf %46, %35 : vector<16x128xf32>
    %48 = vector.broadcast %39 : vector<1x128xf32> to vector<16x128xf32>
    %49 = arith.mulf %47, %48 : vector<16x128xf32>
    %cst_31 = arith.constant -5.000000e-01 : f32
    %50 = vector.broadcast %cst_31 : f32 to vector<16x128xf32>
    %51 = arith.mulf %50, %49 : vector<16x128xf32>
    %52 = arith.mulf %51, %49 : vector<16x128xf32>
    %53 = vector.broadcast %37 : vector<1x128xf32> to vector<16x128xf32>
    %54 = arith.subf %52, %53 : vector<16x128xf32>
    %cst_32 = arith.constant 0.918938517 : f32
    %55 = vector.broadcast %cst_32 : f32 to vector<16x128xf32>
    %56 = arith.subf %54, %55 : vector<16x128xf32>
    %57 = tpu.iota {dimensions = array<i32: 1>} : vector<16x128xi32>
    %c8_i32 = arith.constant 8 : i32
    %58 = vector.broadcast %c8_i32 : i32 to vector<16x128xi32>
    %59 = arith.cmpi slt, %57, %58 : vector<16x128xi32>
    %cst_33 = arith.constant 0.000000e+00 : f32
    %60 = vector.broadcast %cst_33 : f32 to vector<16x128xf32>
    %61 = arith.select %59, %56, %60 : vector<16x128xi1>, vector<16x128xf32>
    %cst_34 = arith.constant dense<0.000000e+00> : vector<16xf32>
    %62 = vector.multi_reduction <add>, %61, %cst_34 [1] : vector<16x128xf32> to vector<16xf32>
    %63 = vector.shape_cast %62 : vector<16xf32> to vector<16x1xf32>
    %64 = tpu.iota {dimensions = array<i32: 1>} : vector<16x128xi32>
    %c8_i32_35 = arith.constant 8 : i32
    %65 = vector.broadcast %c8_i32_35 : i32 to vector<16x128xi32>
    %66 = arith.cmpi eq, %64, %65 : vector<16x128xi32>
    %67 = vector.shape_cast %63 : vector<16x1xf32> to vector<16x1xf32>
    %68 = vector.broadcast %67 : vector<16x1xf32> to vector<16x128xf32>
    %69 = arith.select %66, %68, %46 : vector<16x128xi1>, vector<16x128xf32>
    %c0_36 = arith.constant 0 : index
    %c0_37 = arith.constant 0 : index
    %70 = vector.load %arg12[%c0_36, %c0_37] : memref<16x128xf32, #tpu.memory_space<vmem>>, vector<16x128xf32>
    tpu.vector_store %arg12[%c0_36, %c0_37], %69 {strides = array<i32>} : memref<16x128xf32, #tpu.memory_space<vmem>>, vector<16x128xf32>,
    return
  }
  func.func @transform_0(%arg0: i32) -> (i32, i32) {
    %c0_i32 = arith.constant 0 : i32
    %c0_i32_0 = arith.constant 0 : i32
    return %arg0, %c0_i32 : i32, i32
  }
  func.func @transform_1(%arg0: i32) -> (i32, i32) {
    %c0_i32 = arith.constant 0 : i32
    %c0_i32_0 = arith.constant 0 : i32
    return %arg0, %c0_i32 : i32, i32
  }
  func.func @transform_2(%arg0: i32) -> (i32, i32) {
    %c0_i32 = arith.constant 0 : i32
    %c0_i32_0 = arith.constant 0 : i32
    %c0_i32_1 = arith.constant 0 : i32
    return %c0_i32, %c0_i32_0 : i32, i32
  }
  func.func @transform_3(%arg0: i32) -> (i32, i32) {
    %c0_i32 = arith.constant 0 : i32
    %c0_i32_0 = arith.constant 0 : i32
    %c0_i32_1 = arith.constant 0 : i32
    return %c0_i32, %c0_i32_0 : i32, i32
  }
  func.func @transform_4(%arg0: i32) -> (i32, i32) {
    %c0_i32 = arith.constant 0 : i32
    %c0_i32_0 = arith.constant 0 : i32
    %c0_i32_1 = arith.constant 0 : i32
    return %c0_i32, %c0_i32_0 : i32, i32
  }
  func.func @transform_5(%arg0: i32) -> (i32, i32) {
    %c0_i32 = arith.constant 0 : i32
    %c0_i32_0 = arith.constant 0 : i32
    %c0_i32_1 = arith.constant 0 : i32
    return %c0_i32, %c0_i32_0 : i32, i32
  }
  func.func @transform_6(%arg0: i32) -> (i32, i32) {
    %c0_i32 = arith.constant 0 : i32
    %c0_i32_0 = arith.constant 0 : i32
    %c0_i32_1 = arith.constant 0 : i32
    return %c0_i32, %c0_i32_0 : i32, i32
  }
  func.func @transform_7(%arg0: i32) -> (i32, i32) {
    %c0_i32 = arith.constant 0 : i32
    %c0_i32_0 = arith.constant 0 : i32
    %c0_i32_1 = arith.constant 0 : i32
    return %c0_i32, %c0_i32_0 : i32, i32
  }
  func.func @transform_8(%arg0: i32) -> (i32, i32) {
    %c0_i32 = arith.constant 0 : i32
    %c0_i32_0 = arith.constant 0 : i32
    %c0_i32_1 = arith.constant 0 : i32
    return %c0_i32, %c0_i32_0 : i32, i32
  }
  func.func @transform_9(%arg0: i32) -> (i32, i32) {
    %c0_i32 = arith.constant 0 : i32
    %c0_i32_0 = arith.constant 0 : i32
    %c0_i32_1 = arith.constant 0 : i32
    return %c0_i32, %c0_i32_0 : i32, i32
  }
  func.func @transform_10(%arg0: i32) -> (i32, i32) {
    %c0_i32 = arith.constant 0 : i32
    %c0_i32_0 = arith.constant 0 : i32
    %c0_i32_1 = arith.constant 0 : i32
    return %c0_i32, %c0_i32_0 : i32, i32
  }
  func.func @transform_11(%arg0: i32) -> (i32, i32) {
    %c0_i32 = arith.constant 0 : i32
    %c0_i32_0 = arith.constant 0 : i32
    return %arg0, %c0_i32 : i32, i32
  }
}

</mosaic_0001>

<bundles_post_ra>
// kernel: tpu_custom_call.1
= control target key start
LH: loop header
LB: loop body
LE: loop exit
PB: predicated region body
PF: predicated region fallthrough
CT: control target
= control target key end

     0   :  { %16 = vsyncpa [#allocation3], 0  ;;  %s1173_s0 = inlined_call_operand.vmem [shape: f32[16,16], index: 0, kind: input, shape index: {}]   ;;  %s1174_s1 = inlined_call_operand.vmem [shape: f32[16,8], index: 1, kind: input, shape index: {}]   ;;  %s1175_s2 = inlined_call_operand.hbm [shape: bf16[128,128], index: 2, kind: input, shape index: {}]   ;;  %s1176_s3 = inlined_call_operand.vmem [shape: f32[1,128], index: 3, kind: input, shape index: {}]   ;;  %s1177_s4 = inlined_call_operand.hbm [shape: bf16[128,128], index: 4, kind: input, shape index: {}]   ;;  %s1178_s5 = inlined_call_operand.vmem [shape: f32[1,128], index: 5, kind: input, shape index: {}]   ;;  %s1179_s6 = inlined_call_operand.hbm [shape: bf16[128,128], index: 6, kind: input, shape index: {}]   ;;  %s1180_s7 = inlined_call_operand.vmem [shape: f32[1,128], index: 7, kind: input, shape index: {}]   ;;  %s1181_s8 = inlined_call_operand.hbm [shape: bf16[128,128], index: 8, kind: input, shape index: {}]   ;;  %s1182_s9 = inlined_call_operand.vmem [shape: f32[1,128], index: 9, kind: input, shape index: {}]   ;;  %s1183_s10 = inlined_call_operand.vmem [shape: f32[8,128], index: 10, kind: input, shape index: {}]   ;;  %s1184_s11 = inlined_call_operand.hbm [shape: f32[16,128], index: 11, kind: output, shape index: {}]  }
   0x1   :  { %17 = vsyncpa [#allocation6], 0 }
   0x2   :  { %18 = vsyncpa [#allocation9], 0 }
   0x3   :  { %19 = vsyncpa [#allocation4], 0  ;;  %s949_s17 = smov [#allocation5]   ;;  %s950_s19 = smov [#allocation2]  }
   0x4   :  { %s43_s18 = sshll.u32 %s949_s17, 4  ;;  %s29_s20 = sshll.u32 %s950_s19, 4  ;;  %s44_s18 = int_to_ptr.vmem [resolvable:$true] %s43_s18  ;;  %s1020_s20 = int_to_ptr.vmem [resolvable:$true] %s29_s20 }
   0x5   :  { %s831_s23 = scalar_lea.hbm %s1177_s4, 1024 }
   0x6   :  { %p832_p0 = scmp.ne.s32.totalorder %s1177_s4, %s831_s23  ;;  %p835_p1 = scmp.lt.u32.totalorder %s831_s23, %s1177_s4 }
   0x8   :  { %p837_p2 = pnand %p835_p1, %p832_p0 }
   0xa   :  { %840 = shalt.err (!%p837_p2)
}
   0xb   :  { %s841_s28 = scalar_lea.vmem %s44_s18, 1024  ;;  %p846_p4 = scmp.lt.s32.totalorder %s44_s18, %s44_s18 }
   0xc   :  { %p842_p3 = scmp.ne.s32.totalorder %s44_s18, %s841_s28  ;;  %p847_p5 = scmp.lt.s32.totalorder %s841_s28, %s841_s28 }
   0xe   :  { %p848_p6 = por %p847_p5, %p846_p4 }
  0x10   :  { %p849_p7 = pnand %p848_p6, %p842_p3 }
  0x12   :  { %852 = shalt.err (!%p849_p7)
}
  0x13   :  { %s951_s29 = smov 64   ;;  %s952_s30 = smov 4  }
  0x14   :  { %49 = dma.hbm_to_vmem [thread:$0]  %s1177_s4, 1024, %s44_s18, [#allocation6], %s951_s29, %s951_s29, %s952_s30  }
  0x15   :  { %s853_s16 = scalar_lea.hbm %s1175_s2, 1024 }
  0x16   :  { %p854_p8 = scmp.ne.s32.totalorder %s1175_s2, %s853_s16  ;;  %p857_p9 = scmp.lt.u32.totalorder %s853_s16, %s1175_s2 }
  0x18   :  { %p859_p10 = pnand %p857_p9, %p854_p8 }
  0x1a   :  { %862 = shalt.err (!%p859_p10)
}
  0x1b   :  { %s863_s23 = scalar_lea.vmem %s1020_s20, 1024  ;;  %p868_p12 = scmp.lt.s32.totalorder %s1020_s20, %s1020_s20 }
  0x1c   :  { %p864_p11 = scmp.ne.s32.totalorder %s1020_s20, %s863_s23  ;;  %p869_p13 = scmp.lt.s32.totalorder %s863_s23, %s863_s23 }
  0x1e   :  { %p870_p0 = por %p869_p13, %p868_p12 }
  0x20   :  { %p871_p1 = pnand %p870_p0, %p864_p11 }
  0x22   :  { %874 = shalt.err (!%p871_p1)
}
  0x23   :  { %35 = dma.hbm_to_vmem [thread:$0]  %s1175_s2, 1024, %s1020_s20, [#allocation3], %s951_s29, %s951_s29, %s952_s30  }
  0x24   :  { %s953_s24 = smov [#allocation7]   ;;  %s954_s26 = smov [#allocation8]  }
  0x25   :  { %s57_s25 = sshll.u32 %s953_s24, 4  ;;  %s71_s27 = sshll.u32 %s954_s26, 4  ;;  %s58_s25 = int_to_ptr.vmem [resolvable:$true] %s57_s25  ;;  %s1057_s27 = int_to_ptr.vmem [resolvable:$true] %s71_s27 }
  0x26   :  { %s875_s13 = scalar_lea.hbm %s1179_s6, 1024 }
  0x27   :  { %p876_p2 = scmp.ne.s32.totalorder %s1179_s6, %s875_s13  ;;  %p879_p3 = scmp.lt.u32.totalorder %s875_s13, %s1179_s6 }
  0x29   :  { %p881_p4 = pnand %p879_p3, %p876_p2 }
  0x2b   :  { %884 = shalt.err (!%p881_p4)
}
  0x2c   :  { %s885_s2 = scalar_lea.vmem %s58_s25, 1024  ;;  %p890_p6 = scmp.lt.s32.totalorder %s58_s25, %s58_s25 }
  0x2d   :  { %p886_p5 = scmp.ne.s32.totalorder %s58_s25, %s885_s2  ;;  %p891_p7 = scmp.lt.s32.totalorder %s885_s2, %s885_s2 }
  0x2f   :  { %p892_p8 = por %p891_p7, %p890_p6 }
  0x31   :  { %p893_p9 = pnand %p892_p8, %p886_p5 }
  0x33   :  { %896 = shalt.err (!%p893_p9)
}
  0x34   :  { %63 = dma.hbm_to_vmem [thread:$0]  %s1179_s6, 1024, %s58_s25, [#allocation6], %s951_s29, %s951_s29, %s952_s30  }
  0x35   :  { %s897_s23 = scalar_lea.hbm %s1181_s8, 1024 }
  0x36   :  { %p898_p10 = scmp.ne.s32.totalorder %s1181_s8, %s897_s23  ;;  %p901_p11 = scmp.lt.u32.totalorder %s897_s23, %s1181_s8 }
  0x38   :  { %p903_p12 = pnand %p901_p11, %p898_p10 }
  0x3a   :  { %906 = shalt.err (!%p903_p12)
}
  0x3b   :  { %s907_s28 = scalar_lea.vmem %s1057_s27, 1024  ;;  %p912_p0 = scmp.lt.s32.totalorder %s1057_s27, %s1057_s27 }
  0x3c   :  { %p908_p13 = scmp.ne.s32.totalorder %s1057_s27, %s907_s28  ;;  %p913_p1 = scmp.lt.s32.totalorder %s907_s28, %s907_s28 }
  0x3e   :  { %p914_p2 = por %p913_p1, %p912_p0 }
  0x40   :  { %p915_p3 = pnand %p914_p2, %p908_p13 }
  0x42   :  { %918 = shalt.err (!%p915_p3)
}
  0x43   :  { %77 = dma.hbm_to_vmem [thread:$0]  %s1181_s8, 1024, %s1057_s27, [#allocation9], %s951_s29, %s951_s29, %s952_s30  }
  0x44   :  { %941 = dma.done.wait [#allocation3], 1024  }
  0x45   :  { %942 = vsyncadd [#allocation3], 4294966272 }
  0x46   :  { %943 = dma.done.wait [#allocation6], 2048  }
  0x47   :  { %944 = vsyncadd [#allocation6], 4294965248 }
  0x48   :  { %945 = dma.done.wait [#allocation9], 1024  }
  0x49   :  { %946 = vsyncadd [#allocation9], 4294966272  ;;  %v955_v0 = vmov 0.0   ;;  %vm956_vm0 = vmmov 0   ;;  %v799_v1 = vld [vmem:[#allocation2] sm:$0xff]   ;;  %v800_v2 = vld [vmem:[#allocation2 + $0x8] sm:$0xff]  }
  0x4a   :  { %708 = vmatprep.subr.bf16.mxu0 %v955_v0  ;;  %724 = vmatprep.mubr.msk.bf16.mxu0 %vm956_vm0, %v955_v0  ;;  %v801_v3 = vld [vmem:[#allocation2 + $0x10] sm:$0xff]   ;;  %v807_v4 = vld [vmem:[#allocation5] sm:$0xff]   ;;  %v802_v5 = vld [vmem:[#allocation2 + $0x18] sm:$0xff]   ;;  %vm97_vm1 = vcmask 130048   ;;  %vm103_vm3 = vcmask 64512  }
  0x4b   :  { %728 = vmatprep.subr.bf16.mxu1 %v955_v0  ;;  %744 = vmatprep.mubr.msk.bf16.mxu1 %vm956_vm0, %v955_v0  ;;  %v808_v6 = vld [vmem:[#allocation5 + $0x8] sm:$0xff]   ;;  %v803_v7 = vld [vmem:[#allocation2 + $0x20] sm:$0xff]   ;;  %v809_v8 = vld [vmem:[#allocation5 + $0x10] sm:$0xff]  }
  0x4c   :  { %709 = vmatpush3.bf16.msra.mxu0 %v799_v1  ;;  %729 = vmatpush3.bf16.msra.mxu1 %v807_v4  ;;  %v804_v9 = vld [vmem:[#allocation2 + $0x28] sm:$0xff]   ;;  %v810_v10 = vld [vmem:[#allocation5 + $0x18] sm:$0xff]   ;;  %v805_v11 = vld [vmem:[#allocation2 + $0x30] sm:$0xff]  }
  0x4d   :  { %710 = vmatprep.subr.bf16.mxu0 %v955_v0  ;;  %730 = vmatprep.subr.bf16.mxu1 %v955_v0  ;;  %v811_v12 = vld [vmem:[#allocation5 + $0x20] sm:$0xff]   ;;  %v806_v13 = vld [vmem:[#allocation2 + $0x38] sm:$0xff]   ;;  %v96_v15 = vld [vmem:[%s1173_s0 + $0x8] sm:$0xff] }
  0x4e   :  { %v95_v14 = vld [vmem:[%s1173_s0] sm:$0xff]  ;;  %v812_v16 = vld [vmem:[#allocation5 + $0x28] sm:$0xff]   ;;  %vm638_vm2 = vmpackc.low %vm97_vm1, %vm97_vm1 }
  0x4f   :  { %v639_v17 = vpack.c.bf16 %v96_v15, %v95_v14  ;;  %v813_v18 = vld [vmem:[#allocation5 + $0x30] sm:$0xff]   ;;  %v814_v19 = vld [vmem:[#allocation5 + $0x38] sm:$0xff]   ;;  %v815_v20 = vld [vmem:[#allocation7] sm:$0xff]  }
  0x50   :  { %711 = vmatpush3.bf16.msra.mxu0 %v800_v2  ;;  %731 = vmatpush3.bf16.msra.mxu1 %v808_v6  ;;  %v816_v21 = vld [vmem:[#allocation7 + $0x8] sm:$0xff]   ;;  %v817_v22 = vld [vmem:[#allocation7 + $0x10] sm:$0xff]   ;;  %v818_v23 = vld [vmem:[#allocation7 + $0x18] sm:$0xff]  }
  0x51   :  { %712 = vmatprep.subr.bf16.mxu0 %v955_v0  ;;  %732 = vmatprep.subr.bf16.mxu1 %v955_v0  ;;  %v819_v24 = vld [vmem:[#allocation7 + $0x20] sm:$0xff]   ;;  %v820_v25 = vld [vmem:[#allocation7 + $0x28] sm:$0xff]   ;;  %v821_v36 = vld [vmem:[#allocation7 + $0x30] sm:$0xff]  }
  0x52   :  { %v629_v26 = vld [vmem:[%s1176_s3] ss:$0 sm:$0xff]  ;;  %v822_v37 = vld [vmem:[#allocation7 + $0x38] sm:$0xff]   ;;  %v824_v39 = vld [vmem:[#allocation8 + $0x8] sm:$0xff]  }
  0x53   :  { %v823_v38 = vld [vmem:[#allocation8] sm:$0xff]   ;;  %v825_v40 = vld [vmem:[#allocation8 + $0x10] sm:$0xff]   ;;  %v826_v41 = vld [vmem:[#allocation8 + $0x18] sm:$0xff]  }
  0x54   :  { %713 = vmatpush3.bf16.msra.mxu0 %v801_v3  ;;  %733 = vmatpush3.bf16.msra.mxu1 %v809_v8  ;;  %v827_v42 = vld [vmem:[#allocation8 + $0x20] sm:$0xff]   ;;  %v828_v43 = vld [vmem:[#allocation8 + $0x28] sm:$0xff]   ;;  %v829_v54 = vld [vmem:[#allocation8 + $0x30] sm:$0xff]   ;;  %v564_v3 = vlaneseq }
  0x55   :  { %714 = vmatprep.subr.bf16.mxu0 %v955_v0  ;;  %734 = vmatprep.subr.bf16.mxu1 %v955_v0  ;;  %v641_v44 = vld [vmem:[%s1178_s5] ss:$0 sm:$0xff]  ;;  %v830_v55 = vld [vmem:[#allocation8 + $0x38] sm:$0xff]   ;;  %v102_v8 = vld [vmem:[%s1174_s1 + $0x8] sm:$0xff] }
  0x56   :  { %v650_v56 = vld [vmem:[%s1180_s7] ss:$0 sm:$0xff]  ;;  %v565_v4 = vshrl.u32 %v564_v3, 7 }
  0x57   :  { %v101_v6 = vld [vmem:[%s1174_s1] sm:$0xff]  ;;  %s957_s1 = smov [#allocation10]  }
  0x58   :  { %715 = vmatpush3.bf16.msra.mxu0 %v802_v5  ;;  %735 = vmatpush3.bf16.msra.mxu1 %v810_v10  ;;  %v566_v5 = vsub.s32 1, %v565_v4  ;;  %v659_v10 = vld [vmem:[%s1182_s9] ss:$0 sm:$0xff]  ;;  %v580_v15 = vsub.s32 2, %v565_v4  ;;  %s615_s9 = sshll.u32 %s957_s1, 4  ;;  %s616_s9 = int_to_ptr.vmem [resolvable:$true] %s615_s9 }
  0x59   :  { %716 = vmatprep.subr.bf16.mxu0 %v955_v0  ;;  %736 = vmatprep.subr.bf16.mxu1 %v955_v0  ;;  %p924_p5 = scmp.lt.s32.totalorder %s616_s9, %s616_s9 }
  0x5c   :  { %717 = vmatpush3.bf16.msra.mxu0 %v803_v7  ;;  %737 = vmatpush3.bf16.msra.mxu1 %v811_v12 }
  0x5d   :  { %718 = vmatprep.subr.bf16.mxu0 %v955_v0  ;;  %738 = vmatprep.subr.bf16.mxu1 %v955_v0 }
  0x60   :  { %719 = vmatpush3.bf16.msra.mxu0 %v804_v9  ;;  %739 = vmatpush3.bf16.msra.mxu1 %v812_v16  ;;  %v104_v9 = vsel %vm103_vm3, %v101_v6, 0.0 }
  0x61   :  { %720 = vmatprep.subr.bf16.mxu0 %v955_v0  ;;  %740 = vmatprep.subr.bf16.mxu1 %v955_v0 }
  0x64   :  { %721 = vmatpush3.bf16.msra.mxu0 %v805_v11  ;;  %741 = vmatpush3.bf16.msra.mxu1 %v813_v18  ;;  %v105_v11 = vsel %vm103_vm3, %v102_v8, 0.0 }
  0x65   :  { %722 = vmatprep.subr.bf16.mxu0 %v955_v0  ;;  %742 = vmatprep.subr.bf16.mxu1 %v955_v0 }
  0x68   :  { %723 = vmatpush3.bf16.msra.mxu0 %v806_v13  ;;  %743 = vmatpush3.bf16.msra.mxu1 %v814_v19 }
  0x69   :  { %748 = vmatprep.subr.bf16.mxu0 %v955_v0  ;;  %768 = vmatprep.subr.bf16.mxu1 %v955_v0 }
  0x6b   :  { %725 = vmatmul.mubr.msk.bf16.vlgmr.msra.gmra.mrb[0].mxu0 %vm638_vm2, %v639_v17 }
  0x6c   :  { %764 = vmatprep.mubr.msk.bf16.mxu0 %vm956_vm0, %v955_v0  ;;  %749 = vmatpush3.bf16.msra.mxu0 %v815_v20 }
  0x6d   :  { %750 = vmatprep.subr.bf16.mxu0 %v955_v0 }
  0x70   :  { %751 = vmatpush3.bf16.msra.mxu0 %v816_v21 }
  0x71   :  { %752 = vmatprep.subr.bf16.mxu0 %v955_v0 }
  0x74   :  { %753 = vmatpush3.bf16.msra.mxu0 %v817_v22 }
  0x75   :  { %754 = vmatprep.subr.bf16.mxu0 %v955_v0 }
  0x78   :  { %755 = vmatpush3.bf16.msra.mxu0 %v818_v23 }
  0x79   :  { %756 = vmatprep.subr.bf16.mxu0 %v955_v0 }
  0x7c   :  { %757 = vmatpush3.bf16.msra.mxu0 %v819_v24 }
  0x7d   :  { %758 = vmatprep.subr.bf16.mxu0 %v955_v0 }
  0x80   :  { %759 = vmatpush3.bf16.msra.mxu0 %v820_v25 }
  0x81   :  { %760 = vmatprep.subr.bf16.mxu0 %v955_v0 }
  0x84   :  { %761 = vmatpush3.bf16.msra.mxu0 %v821_v36 }
  0x85   :  { %762 = vmatprep.subr.bf16.mxu0 %v955_v0 }
  0x88   :  { %763 = vmatpush3.bf16.msra.mxu0 %v822_v37 }
 0x13e   :  { %v211_v27 = vpop.f32.mrb[0].mxu0 }
 0x13f   :  { %v212_v28 = vadd.f32 %v629_v26, %v211_v27  ;;  %v726_v29 = vpop.f32.mrb[1].mxu0  ;;  %v590_v27 = vsub.s32 0, %v565_v4 }
 0x140   :  { %v214_v30 = vpop.f32.mrb[2].mxu0 }
 0x141   :  { %v215_v31 = vadd.f32 %v629_v26, %v214_v30  ;;  %v727_v32 = vpop.f32.mrb[3].mxu0  ;;  %v218_v33 = vmax.f32 %v212_v28, 0.0 }
 0x143   :  { %v219_v34 = vmax.f32 %v215_v31, 0.0 }
 0x145   :  { %v220_v35 = vpack.c.bf16 %v219_v34, %v218_v33  ;;  %v597_v33 = vand.u32 127, %v564_v3 }
 0x147   :  { %745 = vmatmul.mubr.bf16.vlgmr.msra.gmra.mrb[0].mxu1 %v220_v35  ;;  %vm598_vm4 = vcmp.lt.s32.totalorder %v597_v33, 8  ;;  %vm605_vm5 = vcmp.eq.s32.totalorder %v597_v33, 8 }
 0x148   :  { %784 = vmatprep.mubr.msk.bf16.mxu1 %vm956_vm0, %v955_v0  ;;  %769 = vmatpush3.bf16.msra.mxu1 %v823_v38 }
 0x149   :  { %770 = vmatprep.subr.bf16.mxu1 %v955_v0 }
 0x14c   :  { %771 = vmatpush3.bf16.msra.mxu1 %v824_v39 }
 0x14d   :  { %772 = vmatprep.subr.bf16.mxu1 %v955_v0 }
 0x150   :  { %773 = vmatpush3.bf16.msra.mxu1 %v825_v40 }
 0x151   :  { %774 = vmatprep.subr.bf16.mxu1 %v955_v0 }
 0x154   :  { %775 = vmatpush3.bf16.msra.mxu1 %v826_v41 }
 0x155   :  { %776 = vmatprep.subr.bf16.mxu1 %v955_v0 }
 0x158   :  { %777 = vmatpush3.bf16.msra.mxu1 %v827_v42 }
 0x159   :  { %778 = vmatprep.subr.bf16.mxu1 %v955_v0 }
 0x15c   :  { %779 = vmatpush3.bf16.msra.mxu1 %v828_v43 }
 0x15d   :  { %780 = vmatprep.subr.bf16.mxu1 %v955_v0 }
 0x160   :  { %781 = vmatpush3.bf16.msra.mxu1 %v829_v54 }
 0x161   :  { %782 = vmatprep.subr.bf16.mxu1 %v955_v0  ;;  %v563_v0 = vld [vmem:[%s1183_s10] sm:$0xff]  ;;  %s919_s10 = scalar_lea.vmem %s616_s9, 256 }
 0x162   :  { %v567_v7 = vrot.slane %v563_v0, %v566_v5  ;;  %v581_v23 = vrot.slane %v563_v0, %v580_v15  ;;  %v591_v32 = vrot.slane %v563_v0, %v590_v27  ;;  %p920_p4 = scmp.ne.s32.totalorder %s616_s9, %s919_s10  ;;  %p925_p6 = scmp.lt.s32.totalorder %s919_s10, %s919_s10 }
 0x164   :  { %783 = vmatpush3.bf16.msra.mxu1 %v830_v55  ;;  %v568_v12 = vmul.f32 %v567_v7, %v104_v9  ;;  %v569_v17 = vmul.f32 %v567_v7, %v105_v11  ;;  %p926_p7 = por %p925_p6, %p924_p5 }
 0x166   :  { %p927_p8 = pnand %p926_p7, %p920_p4 }
 0x21a   :  { %v326_v45 = vpop.f32.mrb[0].mxu1 }
 0x21b   :  { %v327_v46 = vadd.f32 %v641_v44, %v326_v45  ;;  %v746_v47 = vpop.f32.mrb[1].mxu1 }
 0x21c   :  { %v329_v48 = vpop.f32.mrb[2].mxu1 }
 0x21d   :  { %v330_v49 = vadd.f32 %v641_v44, %v329_v48  ;;  %v747_v50 = vpop.f32.mrb[3].mxu1  ;;  %v333_v51 = vmax.f32 %v327_v46, 0.0 }
 0x21f   :  { %v334_v52 = vmax.f32 %v330_v49, 0.0 }
 0x221   :  { %v335_v53 = vpack.c.bf16 %v334_v52, %v333_v51 }
 0x223   :  { %765 = vmatmul.mubr.bf16.vlgmr.msra.gmra.mrb[4].mxu0 %v335_v53 }
 0x2f6   :  { %v441_v57 = vpop.f32.mrb[4].mxu0 }
 0x2f7   :  { %v442_v58 = vadd.f32 %v650_v56, %v441_v57  ;;  %v766_v59 = vpop.f32.mrb[5].mxu0 }
 0x2f8   :  { %v444_v60 = vpop.f32.mrb[6].mxu0 }
 0x2f9   :  { %v445_v61 = vadd.f32 %v650_v56, %v444_v60  ;;  %v767_v62 = vpop.f32.mrb[7].mxu0  ;;  %v448_v63 = vmax.f32 %v442_v58, 0.0 }
 0x2fb   :  { %v449_v1 = vmax.f32 %v445_v61, 0.0 }
 0x2fd   :  { %v450_v2 = vpack.c.bf16 %v449_v1, %v448_v63 }
 0x2ff   :  { %785 = vmatmul.mubr.bf16.vlgmr.msra.gmra.mrb[4].mxu1 %v450_v2 }
 0x3d2   :  { %v556_v13 = vpop.f32.mrb[4].mxu1 }
 0x3d3   :  { %v557_v14 = vadd.f32 %v659_v10, %v556_v13  ;;  %v786_v16 = vpop.f32.mrb[5].mxu1 }
 0x3d4   :  { %v559_v18 = vpop.f32.mrb[6].mxu1 }
 0x3d5   :  { %v570_v19 = vadd.f32 %v568_v12, %v557_v14  ;;  %v560_v20 = vadd.f32 %v659_v10, %v559_v18  ;;  %v787_v21 = vpop.f32.mrb[7].mxu1 }
 0x3d7   :  { %v668_v22 = vclamps-f32 %v570_v19, 1.0  ;;  %v571_v24 = vadd.f32 %v569_v17, %v560_v20 }
 0x3d9   :  { %v576_v25 = vsub.f32 %v668_v22, %v557_v14  ;;  %v669_v26 = vclamps-f32 %v571_v24, 1.0 }
 0x3db   :  { %v582_v28 = vmul.f32 %v581_v23, %v576_v25  ;;  %v577_v29 = vsub.f32 %v669_v26, %v560_v20 }
 0x3dd   :  { %v583_v30 = vmul.f32 %v581_v23, %v577_v29  ;;  %v584_v31 = vmul.f32 -0.5, %v582_v28 }
 0x3df   :  { %v585_v34 = vmul.f32 -0.5, %v583_v30  ;;  %v586_v35 = vmul.f32 %v584_v31, %v582_v28 }
 0x3e1   :  { %v592_v36 = vsub.f32 %v586_v35, %v591_v32  ;;  %v587_v37 = vmul.f32 %v585_v34, %v583_v30 }
 0x3e3   :  { %v670_v38 = vadd.f32 -0.9189385, %v592_v36  ;;  %v593_v39 = vsub.f32 %v587_v37, %v591_v32 }
 0x3e5   :  { %v599_v40 = vsel %vm598_vm4, %v670_v38, 0.0  ;;  %v671_v41 = vadd.f32 -0.9189385, %v593_v39 }
 0x3e6   :  { %601 = vadd.xlane.f32.xlu0 %v599_v40 }
 0x3e7   :  { %v600_v42 = vsel %vm598_vm4, %v671_v41, 0.0 }
 0x3ea   :  { %603 = vadd.xlane.f32.xlu0 %v600_v42 }
 0x473   :  { %v602_v43 = vpop.xlane.xlu0 %601 }
 0x474   :  { %v606_v44 = vsel %vm605_vm5, %v602_v43, %v668_v22 }
 0x475   :  { %608 = vst [vmem:[#allocation10] sm:$0xff] %v606_v44 }
 0x477   :  { %v604_v45 = vpop.xlane.xlu0 %603 }
 0x478   :  { %v607_v46 = vsel %vm605_vm5, %v604_v45, %v669_v26 }
 0x479   :  { %609 = vst [vmem:[#allocation10 + $0x8] sm:$0xff] %v607_v46 }
 0x47a   :  { %930 = shalt.err (!%p927_p8)
}
 0x47b   :  { %s931_s4 = scalar_lea.hbm %s1184_s11, 256 }
 0x47c   :  { %p932_p9 = scmp.ne.s32.totalorder %s1184_s11, %s931_s4  ;;  %p935_p10 = scmp.lt.u32.totalorder %s931_s4, %s1184_s11 }
 0x47e   :  { %p937_p11 = pnand %p935_p10, %p932_p9 }
 0x480   :  { %940 = shalt.err (!%p937_p11)
}
 0x481   :  { %s958_s6 = smov 128   ;;  %s959_s25 = smov 8  }
 0x482   :  { %621 = dma.vmem_to_hbm [thread:$0]  %s616_s9, 256, %s1184_s11, [#allocation4], %s958_s6, %s958_s6, %s959_s25  }
 0x483   :  { %947 = dma.done.wait [#allocation4], 256  }
 0x484   :  { %948 = vsyncadd [#allocation4], 4294967040 }
 0x485   :  { %625 = vsyncpa [#allocation3], 1 }
 0x486   :  { %626 = vsyncpa [#allocation6], 1 }
 0x487   :  { %627 = vsyncpa [#allocation9], 1 }
 0x488   :  { %628 = vsyncpa [#allocation4], 1 }

</bundles_post_ra>
